<compile_context>
chip_gen: v7x
topology: tpu7x:2x2x1
jax: 0.10.0
libtpu: 0.0.40
codegen_flags: <defaults>
</compile_context>

<pallas_src>
from types import SimpleNamespace

import jax
import jax.numpy as jnp
from jax.experimental import pallas as pl
from jax.experimental.pallas import tpu as pltpu


def _round_up(x, m):
    return (x + m - 1) // m * m


def _cdiv(a, b):
    return -(-a // b)


_VMEM_LIMIT = 32 * 1024 * 1024   # safe scoped-VMEM budget on v5e/v6e/v7x


# ----------------------------- tiled matmul kernel ---------------------------

def _apply_act(x, act):
    if act == "lrelu":
        return jnp.where(x >= 0.0, x, 0.2 * x)
    if act == "relu":
        return jnp.maximum(x, 0.0)
    if act == "tanh":
        return jnp.tanh(x)
    return x


_MATMUL_KERNEL_CACHE = {}


def _make_matmul_kernel(ranges):
    """ranges: tuple of (act_name, start_col, stop_col) in output columns.

    When len(ranges) > 1 the wrapper guarantees a single N tile, so the static
    per-head column slices below address global output columns directly.  No
    pl.program_id / pl.num_programs is bound inside the pl.when bodies.
    """
    if ranges in _MATMUL_KERNEL_CACHE:
        return _MATMUL_KERNEL_CACHE[ranges]

    def kernel(x_ref, w_ref, b_ref, o_ref, acc_ref):
        k = pl.program_id(2)
        k_last = pl.num_programs(2) - 1

        @pl.when(k == 0)
        def _():
            # fold the bias into the accumulator init (no epilogue add).
            acc_ref[...] = jnp.zeros_like(acc_ref) + b_ref[...]

        acc_ref[...] += jnp.dot(x_ref[...], w_ref[...],
                                preferred_element_type=jnp.float32)

        @pl.when(k == k_last)
        def _():
            acc = acc_ref[...]
            if len(ranges) == 1:
                o_ref[...] = _apply_act(acc, ranges[0][0]).astype(o_ref.dtype)
            else:
                # static column slices: each activation touches only its head.
                prev = 0
                for name, start, stop in ranges:
                    if start > prev:
                        o_ref[:, prev:start] = acc[:, prev:start].astype(o_ref.dtype)
                    o_ref[:, start:stop] = _apply_act(
                        acc[:, start:stop], name).astype(o_ref.dtype)
                    prev = stop
                if prev < acc.shape[1]:
                    o_ref[:, prev:] = acc[:, prev:].astype(o_ref.dtype)

    _MATMUL_KERNEL_CACHE[ranges] = kernel
    return kernel


def _pick_m_tile(M, pref=256, align=16):
    if M >= pref:
        return pref, _round_up(M, pref)
    t = _round_up(max(M, 1), align)
    return t, t


def _pick_lane_tile(N, pref=256):
    if N >= pref:
        return pref, _round_up(N, pref)
    t = _round_up(max(N, 1), 128)
    return t, t


def _pick_k_tile(K):
    # Kp only rounded to a 128 multiple (K=288 pads to 384, not 512).
    Kp = _round_up(max(K, 1), 128)
    if Kp <= 768:
        return Kp, Kp            # single K step
    for t in (512, 384, 256, 128):
        if Kp % t == 0:
            return t, Kp
    return 128, Kp


def matmul_bias(x, w, b, acts="none", out_dtype=jnp.bfloat16):
    """(M,K) @ (K,N) + bias with fused per-column-range activations.

    bf16 MXU operands, f32 VMEM accumulator, bf16 output (halves writeback).
    `acts` is a single activation name or a list of (name, n_cols) covering N.
    """
    M, K = x.shape
    K2, N = w.shape
    assert K2 == K
    if isinstance(acts, str):
        acts = [(acts, N)]
    assert sum(c for _, c in acts) == N

    tm, Mp = _pick_m_tile(M)
    tk, Kp = _pick_k_tile(K)
    tn, Np = _pick_lane_tile(N)

    ranges = []
    off = 0
    for name, c in acts:
        ranges.append((name, off, off + c))
        off += c
    ranges = tuple(ranges)
    if len(ranges) > 1:
        tn = Np                  # single N tile -> static slices are global cols

    xb = x if x.dtype == jnp.bfloat16 else x.astype(jnp.bfloat16)
    if (Mp, Kp) != (M, K):
        xb = jnp.pad(xb, ((0, Mp - M), (0, Kp - K)))
    wb = w.astype(jnp.bfloat16)
    if (Kp, Np) != (K, N):
        wb = jnp.pad(wb, ((0, Kp - K), (0, Np - N)))
    bp = b.astype(jnp.float32).reshape(1, N)
    if Np != N:
        bp = jnp.pad(bp, ((0, 0), (0, Np - N)))

    grid = (Mp // tm, Np // tn, Kp // tk)
    out = pl.pallas_call(
        _make_matmul_kernel(ranges),
        out_shape=jax.ShapeDtypeStruct((Mp, Np), out_dtype),
        grid=grid,
        in_specs=[pl.BlockSpec((tm, tk), lambda i, j, k: (i, k)),
                  pl.BlockSpec((tk, tn), lambda i, j, k: (k, j)),
                  pl.BlockSpec((1, tn), lambda i, j, k: (0, j))],
        out_specs=pl.BlockSpec((tm, tn), lambda i, j, k: (i, j)),
        scratch_shapes=[pltpu.VMEM((tm, tn), jnp.float32)],
        compiler_params=pltpu.CompilerParams(
            dimension_semantics=("parallel", "parallel", "arbitrary"),
            vmem_limit_bytes=_VMEM_LIMIT),
        cost_estimate=pl.CostEstimate(
            flops=2 * Mp * Kp * Np, transcendentals=0,
            bytes_accessed=Mp * Kp * 2 + Kp * Np * 2 + Mp * Np * 2),
    )(xb, wb, bp)
    if (Mp, Np) != (M, N):
        out = out[:M, :N]
    return out


# ----------------------------- streaming reductions --------------------------
# Per-sample streaming sums over (B, rows, 128) slabs in their native dtype;
# the kernels upcast to f32 while accumulating.

def _absdiff_sum_kernel(a_ref, b_ref, o_ref, acc_ref):
    i = pl.program_id(1)
    last = pl.num_programs(1) - 1

    @pl.when(i == 0)
    def _():
        acc_ref[...] = jnp.zeros_like(acc_ref)

    acc_ref[...] += jnp.abs(a_ref[0].astype(jnp.float32) -
                            b_ref[0].astype(jnp.float32))

    @pl.when(i == last)
    def _():
        o_ref[...] = jnp.full((1, 1, 1), jnp.sum(acc_ref[...]), jnp.float32)


def _sqdiff_sum_kernel(a_ref, b_ref, o_ref, acc_ref):
    i = pl.program_id(1)
    last = pl.num_programs(1) - 1

    @pl.when(i == 0)
    def _():
        acc_ref[...] = jnp.zeros_like(acc_ref)

    d = a_ref[0].astype(jnp.float32) - b_ref[0].astype(jnp.float32)
    acc_ref[...] += d * d

    @pl.when(i == last)
    def _():
        o_ref[...] = jnp.full((1, 1, 1), jnp.sum(acc_ref[...]), jnp.float32)


def _sum_kernel(a_ref, o_ref, acc_ref):
    i = pl.program_id(1)
    last = pl.num_programs(1) - 1

    @pl.when(i == 0)
    def _():
        acc_ref[...] = jnp.zeros_like(acc_ref)

    acc_ref[...] += a_ref[0].astype(jnp.float32)

    @pl.when(i == last)
    def _():
        o_ref[...] = jnp.full((1, 1, 1), jnp.sum(acc_ref[...]), jnp.float32)


def _per_sample_sums(kernel, arrays):
    """Per-sample f32 sums for a list of same-shape (B, ...) arrays."""
    B = int(arrays[0].shape[0])
    n = 1
    for d in arrays[0].shape[1:]:
        n *= int(d)
    rows = _cdiv(n, 128)
    tr = min(2048, _round_up(rows, 16))
    ntiles = _cdiv(rows, tr)
    rp = ntiles * tr
    slabs = []
    for a in arrays:
        f = a.reshape(B, n)                     # native dtype (bf16 or f32)
        if rp * 128 != n:
            f = jnp.pad(f, ((0, 0), (0, rp * 128 - n)))
        slabs.append(f.reshape(B, rp, 128))
    out = pl.pallas_call(
        kernel,
        out_shape=jax.ShapeDtypeStruct((B, 1, 1), jnp.float32),
        grid=(B, ntiles),
        in_specs=[pl.BlockSpec((1, tr, 128), lambda b, i: (b, i, 0))] * len(slabs),
        out_specs=pl.BlockSpec((1, 1, 1), lambda b, i: (b, 0, 0)),
        scratch_shapes=[pltpu.VMEM((tr, 128), jnp.float32)],
        compiler_params=pltpu.CompilerParams(
            dimension_semantics=("parallel", "arbitrary"),
            vmem_limit_bytes=_VMEM_LIMIT),
    )(*slabs)
    return out.reshape(B), n


def weighted_l1_mean(a, b, w):
    """torch.mean(F.l1_loss(a, b, reduction='none') * w) with per-sample w (B,)."""
    sums, n = _per_sample_sums(_absdiff_sum_kernel, [a, b])
    return jnp.sum(sums * w.reshape(-1).astype(jnp.float32)) / (a.shape[0] * n)


def l1_mean(a, b):
    sums, n = _per_sample_sums(_absdiff_sum_kernel, [a, b])
    return jnp.sum(sums) / (a.shape[0] * n)


def mse_mean(a, b):
    sums, n = _per_sample_sums(_sqdiff_sum_kernel, [a, b])
    return jnp.sum(sums) / (a.shape[0] * n)


def mean_val(a):
    sums, n = _per_sample_sums(_sum_kernel, [a])
    return jnp.sum(sums) / (a.shape[0] * n)


# ----------------------------- one-hot scatter --------------------------------

def _onehot_kernel(lab_ref, o_ref):
    iota = jax.lax.broadcasted_iota(jnp.int32, o_ref.shape, 1)
    o_ref[...] = (iota == lab_ref[...]).astype(o_ref.dtype)


def one_hot_semantics(label_map, nc):
    """scatter_(1, label, 1.0) equivalent: (B,1,H,W) int -> (B,H,W,nc) NHWC bf16."""
    B, _, H, W = label_map.shape
    M = B * H * W
    lab = label_map.astype(jnp.int32).reshape(M, 1)
    tr = min(1024, _round_up(M, 16))
    ntiles = _cdiv(M, tr)
    Mp = ntiles * tr
    Ncp = _round_up(nc, 128)
    if Mp != M:
        lab = jnp.pad(lab, ((0, Mp - M), (0, 0)))
    oh = pl.pallas_call(
        _onehot_kernel,
        out_shape=jax.ShapeDtypeStruct((Mp, Ncp), jnp.bfloat16),
        grid=(ntiles,),
        in_specs=[pl.BlockSpec((tr, 1), lambda i: (i, 0))],
        out_specs=pl.BlockSpec((tr, Ncp), lambda i: (i, 0)),
        compiler_params=pltpu.CompilerParams(
            dimension_semantics=("parallel",),
            vmem_limit_bytes=_VMEM_LIMIT),
    )(lab)
    # padded rows create a spurious 1.0 at class 0 but are sliced off here.
    return oh[:M, :nc].reshape(B, H, W, nc)


# ------------------------------ conv / layout glue ----------------------------

def nchw_to_nhwc(x):
    return jnp.transpose(x, (0, 2, 3, 1))


def nhwc_to_nchw(x):
    return jnp.transpose(x, (0, 3, 1, 2))


def conv3x3(x, heads, acts):
    """3x3 same-padding conv on NHWC input via bf16 im2col + tiled MXU matmul.

    x: (B,H,W,Cin).  heads: list of (w (Cout,Cin,3,3), b (Cout,)) sharing x
    (fused into one matmul along N).  acts: activation name per head.
    Returns (B,H,W,sum(Cout)) NHWC bf16.
    """
    B, H, W, C = x.shape
    x = x if x.dtype == jnp.bfloat16 else x.astype(jnp.bfloat16)
    xp = jnp.pad(x, ((0, 0), (1, 1), (1, 1), (0, 0)))
    cols = [xp[:, dy:dy + H, dx:dx + W, :] for dy in range(3) for dx in range(3)]
    K = 9 * C
    Kp = _round_up(K, 128)
    if Kp > K:
        # fold the K pad into the concat so matmul_bias does no extra pad pass.
        cols.append(jnp.zeros((B, H, W, Kp - K), jnp.bfloat16))
    patches = jnp.concatenate(cols, axis=-1).reshape(B * H * W, Kp)
    # TODO(synk): build the haloed patches inside the kernel (overlapping row
    # tiles / manual DMA) to avoid the 9x im2col blow-up in HBM at large sizes.
    wmat = jnp.concatenate(
        [wh.transpose(2, 3, 1, 0).reshape(K, wh.shape[0]) for wh, _ in heads], axis=1)
    if Kp > K:
        wmat = jnp.pad(wmat, ((0, Kp - K), (0, 0)))
    bias = jnp.concatenate([bh for _, bh in heads])
    act_spec = [(acts[i], heads[i][0].shape[0]) for i in range(len(heads))]
    y = matmul_bias(patches, wmat, bias, act_spec)
    return y.reshape(B, H, W, -1)


def avg_pool2d(x, k):
    """Average pool on NHWC."""
    if k == 1:
        return x
    B, H, W, C = x.shape
    return x.reshape(B, H // k, k, W // k, k, C).mean(axis=(2, 4))


# ------------------------------ parameter init --------------------------------

def _conv_params(key, cin, cout):
    kw, kb = jax.random.split(key)
    w = jax.random.normal(kw, (cout, cin, 3, 3), jnp.float32) * (0.1 / jnp.sqrt(cin * 9.0))
    b = 0.01 * jax.random.normal(kb, (cout,), jnp.float32)
    return w, b


def init_params(opt, key):
    keys = jax.random.split(key, 16)
    nc = opt.semantic_nc
    p = {}
    # netG stand-in (networks.define_G)
    gin = 3 + 3 + nc + nc
    p["g1"] = _conv_params(keys[0], gin, 32)
    p["g2"] = _conv_params(keys[1], 32, 3)
    p["gw"] = _conv_params(keys[2], gin, 3)        # warp branch
    # netD stand-in: 2-scale PatchGAN (networks.define_D)
    din = nc + 3
    for s in range(2):
        p[f"d{s}_1"] = _conv_params(keys[3 + 3 * s], din, 32)
        p[f"d{s}_2"] = _conv_params(keys[4 + 3 * s], 32, 64)
        p[f"d{s}_3"] = _conv_params(keys[5 + 3 * s], 64, 1)
    # VGG19 stand-in feature extractor: r12, r22, r32, r42, r52
    ch = [3, 8, 16, 32, 32, 32]
    for i in range(5):
        p[f"v{i}"] = _conv_params(keys[9 + i], ch[i], ch[i + 1])
    return p


# --------------------------------- model --------------------------------------

class Pix2PixModelPallas:
    """All image tensors are NHWC bf16/f32 internally; NCHW only at the boundary."""

    def __init__(self, opt, params):
        self.opt = opt
        self.params = params
        self.perceptual_layer = -1 if opt.which_perceptual == "5_2" else -2

    # ---- synthetic sub-networks (Pallas conv matmuls inside) ----
    def vgg_features(self, x, preprocess=True):
        if preprocess:  # vgg_normal_correct preprocessing: [-1,1] -> ImageNet norm
            mean = jnp.array([0.485, 0.456, 0.406], jnp.float32).reshape(1, 1, 1, 3)
            std = jnp.array([0.229, 0.224, 0.225], jnp.float32).reshape(1, 1, 1, 3)
            x = ((x.astype(jnp.float32) + 1.0) * 0.5 - mean) / std
        feats = []
        h = x.astype(jnp.bfloat16)
        for i in range(5):
            h = conv3x3(h, [self.params[f"v{i}"]], ["relu"])
            feats.append(h)
            if i < 4:
                h = avg_pool2d(h, 2)
        return feats

    def netG(self, ref_image, real_image, input_semantics, ref_semantics):
        x = jnp.concatenate([ref_image.astype(jnp.bfloat16),
                             real_image.astype(jnp.bfloat16),
                             input_semantics.astype(jnp.bfloat16),
                             ref_semantics.astype(jnp.bfloat16)], axis=-1)
        # g1 (lrelu) and gw (tanh) share the im2col and one fused matmul.
        h_warp = conv3x3(x, [self.params["g1"], self.params["gw"]], ["lrelu", "tanh"])
        h = h_warp[..., :32]
        warp_full = h_warp[..., 32:]
        fake = conv3x3(h, [self.params["g2"]], ["tanh"])
        warp_out = [avg_pool2d(warp_full, 2), warp_full]
        return {"fake_image": fake, "warp_out": warp_out}

    def netD(self, x):
        outs = []
        for s in range(2):
            h = x if s == 0 else avg_pool2d(x, 2)
            f1 = conv3x3(h, [self.params[f"d{s}_1"]], ["lrelu"])
            f2 = conv3x3(f1, [self.params[f"d{s}_2"]], ["lrelu"])
            out = conv3x3(f2, [self.params[f"d{s}_3"]], ["none"])
            outs.append([f1, f2, out])
        return outs

    # ---- Pix2PixModel methods ----
    def preprocess_input(self, data):
        # ade20k / coco path: one-hot scatter of integer label maps.
        nc = self.opt.label_nc + 1 if self.opt.contain_dontcare_label else self.opt.label_nc
        input_semantics = one_hot_semantics(data["label"], nc)       # NHWC bf16
        ref_semantics = one_hot_semantics(data["label_ref"], nc)     # NHWC bf16
        real_image = nchw_to_nhwc(data["image"]).astype(jnp.float32)
        ref_image = nchw_to_nhwc(data["ref"]).astype(jnp.float32)
        return (data["label"], input_semantics, real_image, data["self_ref"],
                ref_image, data["label_ref"], ref_semantics)

    def discriminate(self, input_semantics, fake_image, real_image):
        sem = input_semantics.astype(jnp.bfloat16)
        fake_concat = jnp.concatenate([sem, fake_image.astype(jnp.bfloat16)], axis=-1)
        real_concat = jnp.concatenate([sem, real_image.astype(jnp.bfloat16)], axis=-1)
        fake_and_real = jnp.concatenate([fake_concat, real_concat], axis=0)
        discriminator_out = self.netD(fake_and_real)
        return self.divide_pred(discriminator_out)

    @staticmethod
    def divide_pred(pred):
        fake = [[t[: t.shape[0] // 2] for t in p] for p in pred]
        real = [[t[t.shape[0] // 2:] for t in p] for p in pred]
        return fake, real

    def criterionGAN(self, preds, target_is_real, for_discriminator):
        # hinge GAN loss with multiscale averaging (SPADE GANLoss semantics)
        total = 0.0
        for p in preds:
            pred = p[-1].astype(jnp.float32)
            if for_discriminator:
                if target_is_real:
                    loss = -mean_val(jnp.minimum(pred - 1.0, 0.0))
                else:
                    loss = -mean_val(jnp.minimum(-pred - 1.0, 0.0))
            else:
                loss = -mean_val(pred)
            total = total + loss
        return total / len(preds)

    def generate_fake(self, input_semantics, real_image, ref_semantics, ref_image, self_ref):
        generate_out = {}
        generate_out["ref_features"] = self.vgg_features(ref_image, preprocess=True)
        generate_out["real_features"] = self.vgg_features(real_image, preprocess=True)
        network_out = self.netG(ref_image, real_image, input_semantics, ref_semantics)
        generate_out.update(network_out)
        return generate_out

    def compute_generator_loss(self, input_label, input_semantics, real_image,
                               ref_label, ref_semantics, ref_image, self_ref):
        opt = self.opt
        G_losses = {}
        generate_out = self.generate_fake(input_semantics, real_image,
                                          ref_semantics, ref_image, self_ref)
        fake_image = generate_out["fake_image"].astype(jnp.float32)
        generate_out["fake_image"] = fake_image

        weights = [1.0 / 32, 1.0 / 16, 1.0 / 8, 1.0 / 4, 1.0]
        sample_weights = (self_ref.astype(jnp.float32).reshape(-1)
                          / (jnp.sum(self_ref) + 1e-5))

        # warping loss
        if opt.weight_warp_self > 0:
            g_warp = 0.0
            for warp in generate_out["warp_out"]:
                scale_factor = real_image.shape[2] // warp.shape[2]   # spatial W (NHWC)
                gt = avg_pool2d(real_image, scale_factor)
                g_warp = g_warp + weighted_l1_mean(warp, gt, sample_weights) * opt.weight_warp_self
            G_losses["G_warp_self"] = g_warp

        # gan loss
        pred_fake, pred_real = self.discriminate(input_semantics, fake_image, real_image)
        G_losses["GAN"] = self.criterionGAN(pred_fake, True, for_discriminator=False) * opt.weight_gan

        if not opt.no_ganFeat_loss:
            num_D = len(pred_fake)
            gan_feat = 0.0
            for i in range(num_D):
                for j in range(len(pred_fake[i]) - 1):
                    gan_feat = gan_feat + l1_mean(pred_fake[i][j], pred_real[i][j]) \
                        * opt.weight_ganFeat / num_D
            G_losses["GAN_Feat"] = gan_feat

        # feature matching loss (VGG)
        fake_features = self.vgg_features(fake_image, preprocess=True)
        fm = 0.0
        for i in range(len(generate_out["real_features"])):
            fm = fm + weights[i] * weighted_l1_mean(
                fake_features[i], generate_out["real_features"][i], sample_weights)
        G_losses["fm"] = fm * opt.weight_vgg * opt.weight_fm_ratio

        # perceptual loss
        feat_loss = mse_mean(fake_features[self.perceptual_layer],
                             generate_out["real_features"][self.perceptual_layer])
        G_losses["perc"] = feat_loss * opt.weight_perceptual

        # TODO(synk): contextual loss (networks.ContextualLoss_forward) and StyleLoss
        # are external modules with no available definition; not reproduced here.
        return G_losses, generate_out

    def forward(self, data, mode, GforD=None):
        (input_label, input_semantics, real_image, self_ref,
         ref_image, ref_label, ref_semantics) = self.preprocess_input(dict(data))
        if mode == "generator":
            g_loss, generated_out = self.compute_generator_loss(
                input_label, input_semantics, real_image, ref_label,
                ref_semantics, ref_image, self_ref)
            out = {"fake_image": nhwc_to_nchw(generated_out["fake_image"]).astype(jnp.float32),
                   "input_semantics": nhwc_to_nchw(input_semantics).astype(jnp.float32),
                   "ref_semantics": nhwc_to_nchw(ref_semantics).astype(jnp.float32),
                   "warp_out": [nhwc_to_nchw(w).astype(jnp.float32)
                                for w in generated_out["warp_out"]],
                   "loss_novgg_featpair": None,
                   "nceloss": None,
                   "contrastive_loss": None}
            return g_loss, out
        elif mode == "discriminator":
            fake_image = nchw_to_nhwc(GforD["fake_image"])
            pred_fake, pred_real = self.discriminate(input_semantics, fake_image, real_image)
            return {"D_Fake": self.criterionGAN(pred_fake, False, True) * self.opt.weight_gan,
                    "D_real": self.criterionGAN(pred_real, True, True) * self.opt.weight_gan}
        elif mode == "inference":
            network_out = self.netG(ref_image, real_image, input_semantics, ref_semantics)
            return {"fake_image": nhwc_to_nchw(network_out["fake_image"]).astype(jnp.float32),
                    "warp_out": [nhwc_to_nchw(w).astype(jnp.float32)
                                 for w in network_out["warp_out"]],
                    "input_semantics": nhwc_to_nchw(input_semantics).astype(jnp.float32),
                    "ref_semantics": nhwc_to_nchw(ref_semantics).astype(jnp.float32)}
        else:
            raise ValueError("|mode| is invalid")


# ----------------------------------- main -------------------------------------

if __name__ == "__main__":
    opt = SimpleNamespace(
        dataset_mode="ade20k", label_nc=12, contain_dontcare_label=True,
        semantic_nc=13,
        weight_warp_self=1000.0, weight_gan=10.0, no_ganFeat_loss=False,
        weight_ganFeat=10.0, which_perceptual="4_2", weight_perceptual=0.001,
        weight_vgg=10.0, weight_fm_ratio=1.0, gan_mode="hinge", isTrain=True,
    )
    key = jax.random.PRNGKey(0)
    kp, k1, k2, k3, k4 = jax.random.split(key, 5)
    B, H, W = 2, 16, 16
    nc = opt.label_nc + 1
    data = {
        "label": jax.random.randint(k1, (B, 1, H, W), 0, nc),
        "label_ref": jax.random.randint(k2, (B, 1, H, W), 0, nc),
        "image": jax.random.uniform(k3, (B, 3, H, W), jnp.float32, -1.0, 1.0),
        "ref": jax.random.uniform(k4, (B, 3, H, W), jnp.float32, -1.0, 1.0),
        "self_ref": jnp.array([1.0, 0.0], jnp.float32),
    }

    params = init_params(opt, kp)
    model = Pix2PixModelPallas(opt, params)

    g_loss, out = model.forward(data, mode="generator")
    for v in g_loss.values():
        jax.block_until_ready(v)
    jax.block_until_ready(out["fake_image"])
    print("KERNEL_OK")
</pallas_src>

<mosaic_0001>
module attributes {stable_mosaic.version = 11 : i64} {
  func.func @_onehot_kernel(%arg0: i32, %arg1: memref<512x1xi32, #tpu.memory_space<vmem>>, %arg2: memref<512x128xbf16, #tpu.memory_space<vmem>>) attributes {dimension_semantics = [#tpu.dimension_semantics<parallel>], iteration_bounds = array<i64: 1>, scalar_prefetch = 0 : i64, scratch_operands = 0 : i64, tpu.core_type = #tpu.core_type<tc>, window_params = [{transform_indices = @transform_0, window_bounds = array<i64: 512, 1>}, {transform_indices = @transform_1, window_bounds = array<i64: 512, 128>}]} {
    %0 = tpu.iota {dimensions = array<i32: 1>} : vector<512x128xi32>
    %c0 = arith.constant 0 : index
    %c0_0 = arith.constant 0 : index
    %1 = vector.load %arg1[%c0, %c0_0] : memref<512x1xi32, #tpu.memory_space<vmem>>, vector<512x1xi32>
    %2 = vector.broadcast %1 : vector<512x1xi32> to vector<512x128xi32>
    %3 = arith.cmpi eq, %0, %2 : vector<512x128xi32>
    %4 = arith.extui %3 : vector<512x128xi1> to vector<512x128xi32>
    %5 = arith.sitofp %4 : vector<512x128xi32> to vector<512x128xf32>
    %6 = arith.truncf %5 : vector<512x128xf32> to vector<512x128xbf16>
    %c0_1 = arith.constant 0 : index
    %c0_2 = arith.constant 0 : index
    %7 = vector.load %arg2[%c0_1, %c0_2] : memref<512x128xbf16, #tpu.memory_space<vmem>>, vector<512x128xbf16>
    tpu.vector_store %arg2[%c0_1, %c0_2], %6 {strides = array<i32>} : memref<512x128xbf16, #tpu.memory_space<vmem>>, vector<512x128xbf16>,
    return
  }
  func.func @transform_0(%arg0: i32) -> (i32, i32) {
    %c0_i32 = arith.constant 0 : i32
    %c0_i32_0 = arith.constant 0 : i32
    return %arg0, %c0_i32 : i32, i32
  }
  func.func @transform_1(%arg0: i32) -> (i32, i32) {
    %c0_i32 = arith.constant 0 : i32
    %c0_i32_0 = arith.constant 0 : i32
    return %arg0, %c0_i32 : i32, i32
  }
}

</mosaic_0001>

<bundles_post_ra>
// kernel: tpu_custom_call.1
= control target key start
LH: loop header
LB: loop body
LE: loop exit
PB: predicated region body
PF: predicated region fallthrough
CT: control target
= control target key end

     0   :  { %v1145_v2 = vmov 0   ;;  %s1494_s0 = inlined_call_operand.vmem [shape: s32[512,1], index: 0, kind: input, shape index: {}]   ;;  %s1495_s1 = inlined_call_operand.hbm [shape: bf16[512,128], index: 1, kind: output, shape index: {}]  }
   0x1   :  { %v13_v0 = vld [vmem:[%s1494_s0 + $0x10] sm:$0xff]  ;;  %v11_v1 = vld [vmem:[%s1494_s0] sm:$0xff]  ;;  %1120 = vset.pattern.permute.xlu1 %v1145_v2  ;;  %1119 = vset.pattern.permute.xlu0 %v1145_v2  ;;  %v14_v3 = vld [vmem:[%s1494_s0 + $0x18] sm:$0xff] }
   0x2   :  { %82 = vperm.xlu1 %1120, %v13_v0   ;;  %76 = vperm.xlu0 %1119, %v11_v1   ;;  %v12_v4 = vld [vmem:[%s1494_s0 + $0x8] sm:$0xff]  ;;  %v15_v6 = vld [vmem:[%s1494_s0 + $0x20] sm:$0xff]  ;;  %v18_v7 = vld [vmem:[%s1494_s0 + $0x38] sm:$0xff] }
   0x3   :  { %v16_v5 = vld [vmem:[%s1494_s0 + $0x28] sm:$0xff]  ;;  %v17_v8 = vld [vmem:[%s1494_s0 + $0x30] sm:$0xff]  ;;  %v19_v10 = vld [vmem:[%s1494_s0 + $0x40] sm:$0xff] }
   0x4   :  { %v20_v9 = vld [vmem:[%s1494_s0 + $0x48] sm:$0xff]  ;;  %v22_v11 = vld [vmem:[%s1494_s0 + $0x58] sm:$0xff]  ;;  %v21_v12 = vld [vmem:[%s1494_s0 + $0x50] sm:$0xff] }
   0x6   :  { %85 = vperm.xlu1 %1120, %v14_v3   ;;  %79 = vperm.xlu0 %1119, %v12_v4  }
   0xa   :  { %91 = vperm.xlu1 %1120, %v16_v5   ;;  %88 = vperm.xlu0 %1119, %v15_v6  }
   0xe   :  { %97 = vperm.xlu1 %1120, %v18_v7   ;;  %94 = vperm.xlu0 %1119, %v17_v8  }
  0x12   :  { %103 = vperm.xlu1 %1120, %v20_v9   ;;  %100 = vperm.xlu0 %1119, %v19_v10  }
  0x13   :  { %6 = vsyncpa [#allocation3], 0  ;;  %v24_v13 = vld [vmem:[%s1494_s0 + $0x68] sm:$0xff]  ;;  %v23_v14 = vld [vmem:[%s1494_s0 + $0x60] sm:$0xff]  ;;  %v9_v1 = vlaneseq  ;;  %v1146_v7 = vmov 0.0  }
  0x14   :  { %v26_v15 = vld [vmem:[%s1494_s0 + $0x78] sm:$0xff]  ;;  %v25_v16 = vld [vmem:[%s1494_s0 + $0x70] sm:$0xff]  ;;  %v28_v17 = vld [vmem:[%s1494_s0 + $0x88] sm:$0xff] }
  0x15   :  { %v27_v18 = vld [vmem:[%s1494_s0 + $0x80] sm:$0xff]  ;;  %v30_v19 = vld [vmem:[%s1494_s0 + $0x98] sm:$0xff]  ;;  %v29_v20 = vld [vmem:[%s1494_s0 + $0x90] sm:$0xff]  ;;  %v1352_v2 = vand.u32 127, %v9_v1 }
  0x16   :  { %109 = vperm.xlu1 %1120, %v22_v11   ;;  %106 = vperm.xlu0 %1119, %v21_v12   ;;  %v32_v21 = vld [vmem:[%s1494_s0 + $0xa8] sm:$0xff]  ;;  %v31_v22 = vld [vmem:[%s1494_s0 + $0xa0] sm:$0xff]  ;;  %v34_v23 = vld [vmem:[%s1494_s0 + $0xb8] sm:$0xff] }
  0x17   :  { %v33_v24 = vld [vmem:[%s1494_s0 + $0xb0] sm:$0xff]  ;;  %v36_v25 = vld [vmem:[%s1494_s0 + $0xc8] sm:$0xff]  ;;  %v35_v26 = vld [vmem:[%s1494_s0 + $0xc0] sm:$0xff] }
  0x18   :  { %v38_v27 = vld [vmem:[%s1494_s0 + $0xd8] sm:$0xff]  ;;  %v37_v28 = vld [vmem:[%s1494_s0 + $0xd0] sm:$0xff]  ;;  %v40_v29 = vld [vmem:[%s1494_s0 + $0xe8] sm:$0xff] }
  0x19   :  { %v39_v30 = vld [vmem:[%s1494_s0 + $0xe0] sm:$0xff]  ;;  %v42_v31 = vld [vmem:[%s1494_s0 + $0xf8] sm:$0xff]  ;;  %v41_v32 = vld [vmem:[%s1494_s0 + $0xf0] sm:$0xff] }
  0x1a   :  { %115 = vperm.xlu1 %1120, %v24_v13   ;;  %112 = vperm.xlu0 %1119, %v23_v14   ;;  %v44_v33 = vld [vmem:[%s1494_s0 + $0x108] sm:$0xff]  ;;  %v43_v34 = vld [vmem:[%s1494_s0 + $0x100] sm:$0xff]  ;;  %v46_v35 = vld [vmem:[%s1494_s0 + $0x118] sm:$0xff] }
  0x1b   :  { %v45_v36 = vld [vmem:[%s1494_s0 + $0x110] sm:$0xff]  ;;  %v48_v37 = vld [vmem:[%s1494_s0 + $0x128] sm:$0xff]  ;;  %v47_v38 = vld [vmem:[%s1494_s0 + $0x120] sm:$0xff] }
  0x1c   :  { %v50_v39 = vld [vmem:[%s1494_s0 + $0x138] sm:$0xff]  ;;  %v49_v40 = vld [vmem:[%s1494_s0 + $0x130] sm:$0xff]  ;;  %v52_v41 = vld [vmem:[%s1494_s0 + $0x148] sm:$0xff] }
  0x1d   :  { %v51_v42 = vld [vmem:[%s1494_s0 + $0x140] sm:$0xff]  ;;  %v54_v43 = vld [vmem:[%s1494_s0 + $0x158] sm:$0xff]  ;;  %v53_v44 = vld [vmem:[%s1494_s0 + $0x150] sm:$0xff] }
  0x1e   :  { %121 = vperm.xlu1 %1120, %v26_v15   ;;  %118 = vperm.xlu0 %1119, %v25_v16   ;;  %v56_v45 = vld [vmem:[%s1494_s0 + $0x168] sm:$0xff]  ;;  %v55_v46 = vld [vmem:[%s1494_s0 + $0x160] sm:$0xff]  ;;  %v58_v47 = vld [vmem:[%s1494_s0 + $0x178] sm:$0xff] }
  0x1f   :  { %v57_v48 = vld [vmem:[%s1494_s0 + $0x170] sm:$0xff]  ;;  %v60_v49 = vld [vmem:[%s1494_s0 + $0x188] sm:$0xff]  ;;  %v59_v50 = vld [vmem:[%s1494_s0 + $0x180] sm:$0xff] }
  0x20   :  { %v62_v51 = vld [vmem:[%s1494_s0 + $0x198] sm:$0xff]  ;;  %v61_v52 = vld [vmem:[%s1494_s0 + $0x190] sm:$0xff]  ;;  %v64_v53 = vld [vmem:[%s1494_s0 + $0x1a8] sm:$0xff] }
  0x21   :  { %v63_v54 = vld [vmem:[%s1494_s0 + $0x1a0] sm:$0xff]  ;;  %v66_v55 = vld [vmem:[%s1494_s0 + $0x1b8] sm:$0xff]  ;;  %v65_v56 = vld [vmem:[%s1494_s0 + $0x1b0] sm:$0xff] }
  0x22   :  { %127 = vperm.xlu1 %1120, %v28_v17   ;;  %124 = vperm.xlu0 %1119, %v27_v18   ;;  %v68_v57 = vld [vmem:[%s1494_s0 + $0x1c8] sm:$0xff]  ;;  %v67_v58 = vld [vmem:[%s1494_s0 + $0x1c0] sm:$0xff]  ;;  %v70_v59 = vld [vmem:[%s1494_s0 + $0x1d8] sm:$0xff] }
  0x23   :  { %v69_v60 = vld [vmem:[%s1494_s0 + $0x1d0] sm:$0xff]  ;;  %v72_v61 = vld [vmem:[%s1494_s0 + $0x1e8] sm:$0xff]  ;;  %v71_v62 = vld [vmem:[%s1494_s0 + $0x1e0] sm:$0xff] }
  0x24   :  { %v74_v63 = vld [vmem:[%s1494_s0 + $0x1f8] sm:$0xff]  ;;  %v73_v0 = vld [vmem:[%s1494_s0 + $0x1f0] sm:$0xff]  ;;  %s1147_s0 = smov [#allocation2]  }
  0x25   :  { %s784_s18 = sshll.u32 %s1147_s0, 4  ;;  %s785_s18 = int_to_ptr.vmem [resolvable:$true] %s784_s18 }
  0x26   :  { %133 = vperm.xlu1 %1120, %v30_v19   ;;  %130 = vperm.xlu0 %1119, %v29_v20   ;;  %s1121_s19 = scalar_lea.vmem %s785_s18, 4096  ;;  %p1126_p1 = scmp.lt.s32.totalorder %s785_s18, %s785_s18 }
  0x27   :  { %p1122_p0 = scmp.ne.s32.totalorder %s785_s18, %s1121_s19  ;;  %p1127_p2 = scmp.lt.s32.totalorder %s1121_s19, %s1121_s19 }
  0x29   :  { %p1128_p3 = por %p1127_p2, %p1126_p1 }
  0x2a   :  { %139 = vperm.xlu1 %1120, %v32_v21   ;;  %136 = vperm.xlu0 %1119, %v31_v22  }
  0x2b   :  { %p1129_p4 = pnand %p1128_p3, %p1122_p0 }
  0x2e   :  { %145 = vperm.xlu1 %1120, %v34_v23   ;;  %142 = vperm.xlu0 %1119, %v33_v24  }
  0x32   :  { %151 = vperm.xlu1 %1120, %v36_v25   ;;  %148 = vperm.xlu0 %1119, %v35_v26  }
  0x36   :  { %157 = vperm.xlu1 %1120, %v38_v27   ;;  %154 = vperm.xlu0 %1119, %v37_v28  }
  0x3a   :  { %163 = vperm.xlu1 %1120, %v40_v29   ;;  %160 = vperm.xlu0 %1119, %v39_v30  }
  0x3e   :  { %169 = vperm.xlu1 %1120, %v42_v31   ;;  %166 = vperm.xlu0 %1119, %v41_v32  }
  0x42   :  { %175 = vperm.xlu1 %1120, %v44_v33   ;;  %172 = vperm.xlu0 %1119, %v43_v34  }
  0x46   :  { %181 = vperm.xlu1 %1120, %v46_v35   ;;  %178 = vperm.xlu0 %1119, %v45_v36  }
  0x4a   :  { %187 = vperm.xlu1 %1120, %v48_v37   ;;  %184 = vperm.xlu0 %1119, %v47_v38  }
  0x4e   :  { %193 = vperm.xlu1 %1120, %v50_v39   ;;  %190 = vperm.xlu0 %1119, %v49_v40  }
  0x52   :  { %199 = vperm.xlu1 %1120, %v52_v41   ;;  %196 = vperm.xlu0 %1119, %v51_v42  }
  0x56   :  { %205 = vperm.xlu1 %1120, %v54_v43   ;;  %202 = vperm.xlu0 %1119, %v53_v44  }
  0x5a   :  { %211 = vperm.xlu1 %1120, %v56_v45   ;;  %208 = vperm.xlu0 %1119, %v55_v46  }
  0x5e   :  { %217 = vperm.xlu1 %1120, %v58_v47   ;;  %214 = vperm.xlu0 %1119, %v57_v48  }
  0x62   :  { %223 = vperm.xlu1 %1120, %v60_v49   ;;  %220 = vperm.xlu0 %1119, %v59_v50  }
  0x66   :  { %229 = vperm.xlu1 %1120, %v62_v51   ;;  %226 = vperm.xlu0 %1119, %v61_v52  }
  0x6a   :  { %235 = vperm.xlu1 %1120, %v64_v53   ;;  %232 = vperm.xlu0 %1119, %v63_v54  }
  0x6e   :  { %241 = vperm.xlu1 %1120, %v66_v55   ;;  %238 = vperm.xlu0 %1119, %v65_v56  }
  0x72   :  { %247 = vperm.xlu1 %1120, %v68_v57   ;;  %244 = vperm.xlu0 %1119, %v67_v58  }
  0x76   :  { %253 = vperm.xlu1 %1120, %v70_v59   ;;  %250 = vperm.xlu0 %1119, %v69_v60  }
  0x7a   :  { %259 = vperm.xlu1 %1120, %v72_v61   ;;  %256 = vperm.xlu0 %1119, %v71_v62  }
  0x7e   :  { %265 = vperm.xlu1 %1120, %v74_v63   ;;  %262 = vperm.xlu0 %1119, %v73_v0  }
  0x81   :  { %v83_v3 = vpop.permute.xlu1 %82  ;;  %v77_v4 = vpop.permute.xlu0 %76 }
  0x82   :  { %vm269_vm0 = vcmp.eq.s32.totalorder %v1352_v2, %v83_v3  ;;  %vm267_vm1 = vcmp.eq.s32.totalorder %v1352_v2, %v77_v4 }
  0x83   :  { %v797_v8 = vsel %vm269_vm0, 1.0, %v1146_v7  ;;  %v795_v9 = vsel %vm267_vm1, 1.0, %v1146_v7 }
  0x85   :  { %v86_v5 = vpop.permute.xlu1 %85  ;;  %v80_v6 = vpop.permute.xlu0 %79 }
  0x86   :  { %vm270_vm2 = vcmp.eq.s32.totalorder %v1352_v2, %v86_v5  ;;  %vm268_vm3 = vcmp.eq.s32.totalorder %v1352_v2, %v80_v6 }
  0x87   :  { %v798_v10 = vsel %vm270_vm2, 1.0, %v1146_v7  ;;  %v796_v11 = vsel %vm268_vm3, 1.0, %v1146_v7 }
  0x88   :  { %v991_v12 = vpack.c.bf16 %v798_v10, %v797_v8  ;;  %v988_v13 = vpack.c.bf16 %v796_v11, %v795_v9 }
  0x89   :  { %v92_v14 = vpop.permute.xlu1 %91  ;;  %v89_v15 = vpop.permute.xlu0 %88 }
  0x8a   :  { %1083 = vst [vmem:[#allocation2 + $0x8] sm:$0xff] %v991_v12   ;;  %989 = vst [vmem:[#allocation2] sm:$0xff] %v988_v13   ;;  %vm272_vm4 = vcmp.eq.s32.totalorder %v1352_v2, %v92_v14  ;;  %vm271_vm5 = vcmp.eq.s32.totalorder %v1352_v2, %v89_v15 }
  0x8b   :  { %v800_v16 = vsel %vm272_vm4, 1.0, %v1146_v7  ;;  %v799_v17 = vsel %vm271_vm5, 1.0, %v1146_v7 }
  0x8c   :  { %v994_v18 = vpack.c.bf16 %v800_v16, %v799_v17 }
  0x8d   :  { %v98_v19 = vpop.permute.xlu1 %97  ;;  %v95_v20 = vpop.permute.xlu0 %94 }
  0x8e   :  { %1084 = vst [vmem:[#allocation2 + $0x10] sm:$0xff] %v994_v18   ;;  %vm274_vm6 = vcmp.eq.s32.totalorder %v1352_v2, %v98_v19  ;;  %vm273_vm7 = vcmp.eq.s32.totalorder %v1352_v2, %v95_v20 }
  0x8f   :  { %v802_v21 = vsel %vm274_vm6, 1.0, %v1146_v7  ;;  %v801_v22 = vsel %vm273_vm7, 1.0, %v1146_v7 }
  0x90   :  { %v997_v23 = vpack.c.bf16 %v802_v21, %v801_v22 }
  0x91   :  { %v104_v24 = vpop.permute.xlu1 %103  ;;  %v101_v25 = vpop.permute.xlu0 %100 }
  0x92   :  { %1085 = vst [vmem:[#allocation2 + $0x18] sm:$0xff] %v997_v23   ;;  %vm276_vm8 = vcmp.eq.s32.totalorder %v1352_v2, %v104_v24  ;;  %vm275_vm9 = vcmp.eq.s32.totalorder %v1352_v2, %v101_v25 }
  0x93   :  { %v804_v26 = vsel %vm276_vm8, 1.0, %v1146_v7  ;;  %v803_v27 = vsel %vm275_vm9, 1.0, %v1146_v7 }
  0x94   :  { %v1000_v28 = vpack.c.bf16 %v804_v26, %v803_v27 }
  0x95   :  { %v110_v29 = vpop.permute.xlu1 %109  ;;  %v107_v30 = vpop.permute.xlu0 %106 }
  0x96   :  { %1086 = vst [vmem:[#allocation2 + $0x20] sm:$0xff] %v1000_v28   ;;  %vm278_vm10 = vcmp.eq.s32.totalorder %v1352_v2, %v110_v29  ;;  %vm277_vm11 = vcmp.eq.s32.totalorder %v1352_v2, %v107_v30 }
  0x97   :  { %v806_v31 = vsel %vm278_vm10, 1.0, %v1146_v7  ;;  %v805_v32 = vsel %vm277_vm11, 1.0, %v1146_v7 }
  0x98   :  { %v1003_v33 = vpack.c.bf16 %v806_v31, %v805_v32 }
  0x99   :  { %v116_v34 = vpop.permute.xlu1 %115  ;;  %v113_v35 = vpop.permute.xlu0 %112 }
  0x9a   :  { %1087 = vst [vmem:[#allocation2 + $0x28] sm:$0xff] %v1003_v33   ;;  %vm280_vm12 = vcmp.eq.s32.totalorder %v1352_v2, %v116_v34  ;;  %vm279_vm13 = vcmp.eq.s32.totalorder %v1352_v2, %v113_v35 }
  0x9b   :  { %v808_v36 = vsel %vm280_vm12, 1.0, %v1146_v7  ;;  %v807_v37 = vsel %vm279_vm13, 1.0, %v1146_v7 }
  0x9c   :  { %v1006_v38 = vpack.c.bf16 %v808_v36, %v807_v37 }
  0x9d   :  { %v122_v39 = vpop.permute.xlu1 %121  ;;  %v119_v40 = vpop.permute.xlu0 %118 }
  0x9e   :  { %1088 = vst [vmem:[#allocation2 + $0x30] sm:$0xff] %v1006_v38   ;;  %vm282_vm14 = vcmp.eq.s32.totalorder %v1352_v2, %v122_v39  ;;  %vm281_vm15 = vcmp.eq.s32.totalorder %v1352_v2, %v119_v40 }
  0x9f   :  { %v810_v41 = vsel %vm282_vm14, 1.0, %v1146_v7  ;;  %v809_v42 = vsel %vm281_vm15, 1.0, %v1146_v7 }
  0xa0   :  { %v1009_v43 = vpack.c.bf16 %v810_v41, %v809_v42 }
  0xa1   :  { %v128_v44 = vpop.permute.xlu1 %127  ;;  %v125_v45 = vpop.permute.xlu0 %124 }
  0xa2   :  { %1089 = vst [vmem:[#allocation2 + $0x38] sm:$0xff] %v1009_v43   ;;  %vm284_vm0 = vcmp.eq.s32.totalorder %v1352_v2, %v128_v44  ;;  %vm283_vm1 = vcmp.eq.s32.totalorder %v1352_v2, %v125_v45 }
  0xa3   :  { %v812_v46 = vsel %vm284_vm0, 1.0, %v1146_v7  ;;  %v811_v47 = vsel %vm283_vm1, 1.0, %v1146_v7 }
  0xa4   :  { %v1012_v48 = vpack.c.bf16 %v812_v46, %v811_v47 }
  0xa5   :  { %v134_v49 = vpop.permute.xlu1 %133  ;;  %v131_v50 = vpop.permute.xlu0 %130 }
  0xa6   :  { %1090 = vst [vmem:[#allocation2 + $0x40] sm:$0xff] %v1012_v48   ;;  %vm286_vm2 = vcmp.eq.s32.totalorder %v1352_v2, %v134_v49  ;;  %vm285_vm3 = vcmp.eq.s32.totalorder %v1352_v2, %v131_v50 }
  0xa7   :  { %v814_v51 = vsel %vm286_vm2, 1.0, %v1146_v7  ;;  %v813_v52 = vsel %vm285_vm3, 1.0, %v1146_v7 }
  0xa8   :  { %v1015_v53 = vpack.c.bf16 %v814_v51, %v813_v52 }
  0xa9   :  { %v140_v54 = vpop.permute.xlu1 %139  ;;  %v137_v55 = vpop.permute.xlu0 %136 }
  0xaa   :  { %1091 = vst [vmem:[#allocation2 + $0x48] sm:$0xff] %v1015_v53   ;;  %vm288_vm4 = vcmp.eq.s32.totalorder %v1352_v2, %v140_v54  ;;  %vm287_vm5 = vcmp.eq.s32.totalorder %v1352_v2, %v137_v55 }
  0xab   :  { %v816_v56 = vsel %vm288_vm4, 1.0, %v1146_v7  ;;  %v815_v57 = vsel %vm287_vm5, 1.0, %v1146_v7 }
  0xac   :  { %v1018_v58 = vpack.c.bf16 %v816_v56, %v815_v57 }
  0xad   :  { %v146_v59 = vpop.permute.xlu1 %145  ;;  %v143_v60 = vpop.permute.xlu0 %142 }
  0xae   :  { %1092 = vst [vmem:[#allocation2 + $0x50] sm:$0xff] %v1018_v58   ;;  %vm290_vm6 = vcmp.eq.s32.totalorder %v1352_v2, %v146_v59  ;;  %vm289_vm7 = vcmp.eq.s32.totalorder %v1352_v2, %v143_v60 }
  0xaf   :  { %v818_v61 = vsel %vm290_vm6, 1.0, %v1146_v7  ;;  %v817_v62 = vsel %vm289_vm7, 1.0, %v1146_v7 }
  0xb0   :  { %v1021_v63 = vpack.c.bf16 %v818_v61, %v817_v62 }
  0xb1   :  { %v152_v0 = vpop.permute.xlu1 %151  ;;  %v149_v1 = vpop.permute.xlu0 %148 }
  0xb2   :  { %1093 = vst [vmem:[#allocation2 + $0x58] sm:$0xff] %v1021_v63   ;;  %vm292_vm8 = vcmp.eq.s32.totalorder %v1352_v2, %v152_v0  ;;  %vm291_vm9 = vcmp.eq.s32.totalorder %v1352_v2, %v149_v1 }
  0xb3   :  { %v820_v3 = vsel %vm292_vm8, 1.0, %v1146_v7  ;;  %v819_v4 = vsel %vm291_vm9, 1.0, %v1146_v7 }
  0xb4   :  { %v1024_v5 = vpack.c.bf16 %v820_v3, %v819_v4 }
  0xb5   :  { %v158_v6 = vpop.permute.xlu1 %157  ;;  %v155_v8 = vpop.permute.xlu0 %154 }
  0xb6   :  { %1094 = vst [vmem:[#allocation2 + $0x60] sm:$0xff] %v1024_v5   ;;  %vm294_vm10 = vcmp.eq.s32.totalorder %v1352_v2, %v158_v6  ;;  %vm293_vm11 = vcmp.eq.s32.totalorder %v1352_v2, %v155_v8 }
  0xb7   :  { %v822_v9 = vsel %vm294_vm10, 1.0, %v1146_v7  ;;  %v821_v10 = vsel %vm293_vm11, 1.0, %v1146_v7 }
  0xb8   :  { %v1027_v11 = vpack.c.bf16 %v822_v9, %v821_v10 }
  0xb9   :  { %v164_v12 = vpop.permute.xlu1 %163  ;;  %v161_v13 = vpop.permute.xlu0 %160 }
  0xba   :  { %1095 = vst [vmem:[#allocation2 + $0x68] sm:$0xff] %v1027_v11   ;;  %vm296_vm12 = vcmp.eq.s32.totalorder %v1352_v2, %v164_v12  ;;  %vm295_vm13 = vcmp.eq.s32.totalorder %v1352_v2, %v161_v13 }
  0xbb   :  { %v824_v14 = vsel %vm296_vm12, 1.0, %v1146_v7  ;;  %v823_v15 = vsel %vm295_vm13, 1.0, %v1146_v7 }
  0xbc   :  { %v1030_v16 = vpack.c.bf16 %v824_v14, %v823_v15 }
  0xbd   :  { %v170_v17 = vpop.permute.xlu1 %169  ;;  %v167_v18 = vpop.permute.xlu0 %166 }
  0xbe   :  { %1096 = vst [vmem:[#allocation2 + $0x70] sm:$0xff] %v1030_v16   ;;  %vm298_vm14 = vcmp.eq.s32.totalorder %v1352_v2, %v170_v17  ;;  %vm297_vm15 = vcmp.eq.s32.totalorder %v1352_v2, %v167_v18 }
  0xbf   :  { %v826_v19 = vsel %vm298_vm14, 1.0, %v1146_v7  ;;  %v825_v20 = vsel %vm297_vm15, 1.0, %v1146_v7 }
  0xc0   :  { %v1033_v21 = vpack.c.bf16 %v826_v19, %v825_v20 }
  0xc1   :  { %v176_v22 = vpop.permute.xlu1 %175  ;;  %v173_v23 = vpop.permute.xlu0 %172 }
  0xc2   :  { %1097 = vst [vmem:[#allocation2 + $0x78] sm:$0xff] %v1033_v21   ;;  %vm300_vm0 = vcmp.eq.s32.totalorder %v1352_v2, %v176_v22  ;;  %vm299_vm1 = vcmp.eq.s32.totalorder %v1352_v2, %v173_v23 }
  0xc3   :  { %v828_v24 = vsel %vm300_vm0, 1.0, %v1146_v7  ;;  %v827_v25 = vsel %vm299_vm1, 1.0, %v1146_v7 }
  0xc4   :  { %v1036_v26 = vpack.c.bf16 %v828_v24, %v827_v25 }
  0xc5   :  { %v182_v27 = vpop.permute.xlu1 %181  ;;  %v179_v28 = vpop.permute.xlu0 %178 }
  0xc6   :  { %1098 = vst [vmem:[#allocation2 + $0x80] sm:$0xff] %v1036_v26   ;;  %vm302_vm2 = vcmp.eq.s32.totalorder %v1352_v2, %v182_v27  ;;  %vm301_vm3 = vcmp.eq.s32.totalorder %v1352_v2, %v179_v28 }
  0xc7   :  { %v830_v29 = vsel %vm302_vm2, 1.0, %v1146_v7  ;;  %v829_v30 = vsel %vm301_vm3, 1.0, %v1146_v7 }
  0xc8   :  { %v1039_v31 = vpack.c.bf16 %v830_v29, %v829_v30 }
  0xc9   :  { %v188_v32 = vpop.permute.xlu1 %187  ;;  %v185_v33 = vpop.permute.xlu0 %184 }
  0xca   :  { %1099 = vst [vmem:[#allocation2 + $0x88] sm:$0xff] %v1039_v31   ;;  %vm304_vm4 = vcmp.eq.s32.totalorder %v1352_v2, %v188_v32  ;;  %vm303_vm5 = vcmp.eq.s32.totalorder %v1352_v2, %v185_v33 }
  0xcb   :  { %v832_v34 = vsel %vm304_vm4, 1.0, %v1146_v7  ;;  %v831_v35 = vsel %vm303_vm5, 1.0, %v1146_v7 }
  0xcc   :  { %v1042_v36 = vpack.c.bf16 %v832_v34, %v831_v35 }
  0xcd   :  { %v194_v37 = vpop.permute.xlu1 %193  ;;  %v191_v38 = vpop.permute.xlu0 %190 }
  0xce   :  { %1100 = vst [vmem:[#allocation2 + $0x90] sm:$0xff] %v1042_v36   ;;  %vm306_vm6 = vcmp.eq.s32.totalorder %v1352_v2, %v194_v37  ;;  %vm305_vm7 = vcmp.eq.s32.totalorder %v1352_v2, %v191_v38 }
  0xcf   :  { %v834_v39 = vsel %vm306_vm6, 1.0, %v1146_v7  ;;  %v833_v40 = vsel %vm305_vm7, 1.0, %v1146_v7 }
  0xd0   :  { %v1045_v41 = vpack.c.bf16 %v834_v39, %v833_v40 }
  0xd1   :  { %v200_v42 = vpop.permute.xlu1 %199  ;;  %v197_v43 = vpop.permute.xlu0 %196 }
  0xd2   :  { %1101 = vst [vmem:[#allocation2 + $0x98] sm:$0xff] %v1045_v41   ;;  %vm308_vm8 = vcmp.eq.s32.totalorder %v1352_v2, %v200_v42  ;;  %vm307_vm9 = vcmp.eq.s32.totalorder %v1352_v2, %v197_v43 }
  0xd3   :  { %v836_v44 = vsel %vm308_vm8, 1.0, %v1146_v7  ;;  %v835_v45 = vsel %vm307_vm9, 1.0, %v1146_v7 }
  0xd4   :  { %v1048_v46 = vpack.c.bf16 %v836_v44, %v835_v45 }
  0xd5   :  { %v206_v47 = vpop.permute.xlu1 %205  ;;  %v203_v48 = vpop.permute.xlu0 %202 }
  0xd6   :  { %1102 = vst [vmem:[#allocation2 + $0xa0] sm:$0xff] %v1048_v46   ;;  %vm310_vm10 = vcmp.eq.s32.totalorder %v1352_v2, %v206_v47  ;;  %vm309_vm11 = vcmp.eq.s32.totalorder %v1352_v2, %v203_v48 }
  0xd7   :  { %v838_v49 = vsel %vm310_vm10, 1.0, %v1146_v7  ;;  %v837_v50 = vsel %vm309_vm11, 1.0, %v1146_v7 }
  0xd8   :  { %v1051_v51 = vpack.c.bf16 %v838_v49, %v837_v50 }
  0xd9   :  { %v212_v52 = vpop.permute.xlu1 %211  ;;  %v209_v53 = vpop.permute.xlu0 %208 }
  0xda   :  { %1103 = vst [vmem:[#allocation2 + $0xa8] sm:$0xff] %v1051_v51   ;;  %vm312_vm12 = vcmp.eq.s32.totalorder %v1352_v2, %v212_v52  ;;  %vm311_vm13 = vcmp.eq.s32.totalorder %v1352_v2, %v209_v53 }
  0xdb   :  { %v840_v54 = vsel %vm312_vm12, 1.0, %v1146_v7  ;;  %v839_v55 = vsel %vm311_vm13, 1.0, %v1146_v7 }
  0xdc   :  { %v1054_v56 = vpack.c.bf16 %v840_v54, %v839_v55 }
  0xdd   :  { %v218_v57 = vpop.permute.xlu1 %217  ;;  %v215_v58 = vpop.permute.xlu0 %214 }
  0xde   :  { %1104 = vst [vmem:[#allocation2 + $0xb0] sm:$0xff] %v1054_v56   ;;  %vm314_vm14 = vcmp.eq.s32.totalorder %v1352_v2, %v218_v57  ;;  %vm313_vm15 = vcmp.eq.s32.totalorder %v1352_v2, %v215_v58 }
  0xdf   :  { %v842_v59 = vsel %vm314_vm14, 1.0, %v1146_v7  ;;  %v841_v60 = vsel %vm313_vm15, 1.0, %v1146_v7 }
  0xe0   :  { %v1057_v61 = vpack.c.bf16 %v842_v59, %v841_v60 }
  0xe1   :  { %v224_v62 = vpop.permute.xlu1 %223  ;;  %v221_v63 = vpop.permute.xlu0 %220 }
  0xe2   :  { %1105 = vst [vmem:[#allocation2 + $0xb8] sm:$0xff] %v1057_v61   ;;  %vm316_vm0 = vcmp.eq.s32.totalorder %v1352_v2, %v224_v62  ;;  %vm315_vm1 = vcmp.eq.s32.totalorder %v1352_v2, %v221_v63 }
  0xe3   :  { %v844_v0 = vsel %vm316_vm0, 1.0, %v1146_v7  ;;  %v843_v1 = vsel %vm315_vm1, 1.0, %v1146_v7 }
  0xe4   :  { %v1060_v3 = vpack.c.bf16 %v844_v0, %v843_v1 }
  0xe5   :  { %v230_v4 = vpop.permute.xlu1 %229  ;;  %v227_v5 = vpop.permute.xlu0 %226 }
  0xe6   :  { %1106 = vst [vmem:[#allocation2 + $0xc0] sm:$0xff] %v1060_v3   ;;  %vm318_vm2 = vcmp.eq.s32.totalorder %v1352_v2, %v230_v4  ;;  %vm317_vm3 = vcmp.eq.s32.totalorder %v1352_v2, %v227_v5 }
  0xe7   :  { %v846_v6 = vsel %vm318_vm2, 1.0, %v1146_v7  ;;  %v845_v8 = vsel %vm317_vm3, 1.0, %v1146_v7 }
  0xe8   :  { %v1063_v9 = vpack.c.bf16 %v846_v6, %v845_v8 }
  0xe9   :  { %v236_v10 = vpop.permute.xlu1 %235  ;;  %v233_v11 = vpop.permute.xlu0 %232 }
  0xea   :  { %1107 = vst [vmem:[#allocation2 + $0xc8] sm:$0xff] %v1063_v9   ;;  %vm320_vm4 = vcmp.eq.s32.totalorder %v1352_v2, %v236_v10  ;;  %vm319_vm5 = vcmp.eq.s32.totalorder %v1352_v2, %v233_v11 }
  0xeb   :  { %v848_v12 = vsel %vm320_vm4, 1.0, %v1146_v7  ;;  %v847_v13 = vsel %vm319_vm5, 1.0, %v1146_v7 }
  0xec   :  { %v1066_v14 = vpack.c.bf16 %v848_v12, %v847_v13 }
  0xed   :  { %v242_v15 = vpop.permute.xlu1 %241  ;;  %v239_v16 = vpop.permute.xlu0 %238 }
  0xee   :  { %1108 = vst [vmem:[#allocation2 + $0xd0] sm:$0xff] %v1066_v14   ;;  %vm322_vm6 = vcmp.eq.s32.totalorder %v1352_v2, %v242_v15  ;;  %vm321_vm7 = vcmp.eq.s32.totalorder %v1352_v2, %v239_v16 }
  0xef   :  { %v850_v17 = vsel %vm322_vm6, 1.0, %v1146_v7  ;;  %v849_v18 = vsel %vm321_vm7, 1.0, %v1146_v7 }
  0xf0   :  { %v1069_v19 = vpack.c.bf16 %v850_v17, %v849_v18 }
  0xf1   :  { %v248_v20 = vpop.permute.xlu1 %247  ;;  %v245_v21 = vpop.permute.xlu0 %244 }
  0xf2   :  { %1109 = vst [vmem:[#allocation2 + $0xd8] sm:$0xff] %v1069_v19   ;;  %vm324_vm8 = vcmp.eq.s32.totalorder %v1352_v2, %v248_v20  ;;  %vm323_vm9 = vcmp.eq.s32.totalorder %v1352_v2, %v245_v21 }
  0xf3   :  { %v852_v22 = vsel %vm324_vm8, 1.0, %v1146_v7  ;;  %v851_v23 = vsel %vm323_vm9, 1.0, %v1146_v7 }
  0xf4   :  { %v1072_v24 = vpack.c.bf16 %v852_v22, %v851_v23 }
  0xf5   :  { %v254_v25 = vpop.permute.xlu1 %253  ;;  %v251_v26 = vpop.permute.xlu0 %250 }
  0xf6   :  { %1110 = vst [vmem:[#allocation2 + $0xe0] sm:$0xff] %v1072_v24   ;;  %vm326_vm10 = vcmp.eq.s32.totalorder %v1352_v2, %v254_v25  ;;  %vm325_vm11 = vcmp.eq.s32.totalorder %v1352_v2, %v251_v26 }
  0xf7   :  { %v854_v27 = vsel %vm326_vm10, 1.0, %v1146_v7  ;;  %v853_v28 = vsel %vm325_vm11, 1.0, %v1146_v7 }
  0xf8   :  { %v1075_v29 = vpack.c.bf16 %v854_v27, %v853_v28 }
  0xf9   :  { %v260_v30 = vpop.permute.xlu1 %259  ;;  %v257_v31 = vpop.permute.xlu0 %256 }
  0xfa   :  { %1111 = vst [vmem:[#allocation2 + $0xe8] sm:$0xff] %v1075_v29   ;;  %vm328_vm12 = vcmp.eq.s32.totalorder %v1352_v2, %v260_v30  ;;  %vm327_vm13 = vcmp.eq.s32.totalorder %v1352_v2, %v257_v31 }
  0xfb   :  { %v856_v32 = vsel %vm328_vm12, 1.0, %v1146_v7  ;;  %v855_v33 = vsel %vm327_vm13, 1.0, %v1146_v7 }
  0xfc   :  { %v1078_v34 = vpack.c.bf16 %v856_v32, %v855_v33 }
  0xfd   :  { %v266_v35 = vpop.permute.xlu1 %265  ;;  %v263_v36 = vpop.permute.xlu0 %262 }
  0xfe   :  { %1112 = vst [vmem:[#allocation2 + $0xf0] sm:$0xff] %v1078_v34   ;;  %vm330_vm14 = vcmp.eq.s32.totalorder %v1352_v2, %v266_v35  ;;  %vm329_vm15 = vcmp.eq.s32.totalorder %v1352_v2, %v263_v36 }
  0xff   :  { %v858_v37 = vsel %vm330_vm14, 1.0, %v1146_v7  ;;  %v857_v38 = vsel %vm329_vm15, 1.0, %v1146_v7 }
 0x100   :  { %v1081_v39 = vpack.c.bf16 %v858_v37, %v857_v38 }
 0x102   :  { %1113 = vst [vmem:[#allocation2 + $0xf8] sm:$0xff] %v1081_v39  }
 0x103   :  { %1132 = shalt.err (!%p1129_p4)
}
 0x104   :  { %s1133_s22 = scalar_lea.hbm %s1495_s1, 4096 }
 0x105   :  { %p1134_p5 = scmp.ne.s32.totalorder %s1495_s1, %s1133_s22  ;;  %p1137_p6 = scmp.lt.u32.totalorder %s1133_s22, %s1495_s1 }
 0x107   :  { %p1139_p7 = pnand %p1137_p6, %p1134_p5 }
 0x109   :  { %1142 = shalt.err (!%p1139_p7)
}
 0x10a   :  { %s1148_s27 = smov 64   ;;  %s1149_s28 = smov 4  }
 0x10b   :  { %790 = dma.vmem_to_hbm [thread:$0]  %s785_s18, 4096, %s1495_s1, [#allocation3], %s1148_s27, %s1148_s27, %s1149_s28  }
 0x10c   :  { %1143 = dma.done.wait [#allocation3], 4096  }
 0x10d   :  { %1144 = vsyncadd [#allocation3], 4294963200 }
 0x10e   :  { %794 = vsyncpa [#allocation3], 1 }

</bundles_post_ra>
